<compile_context>
chip_gen: v7x
topology: tpu7x:2x2x1
jax: 0.10.0
libtpu: 0.0.40
codegen_flags: <defaults>
</compile_context>

<pallas_src>
import functools

import numpy as np
import jax
import jax.numpy as jnp
from jax.experimental import pallas as pl
from jax.experimental.pallas import tpu as pltpu


# ----------------------------------------------------------------------------
# Pure-JAX glue
# ----------------------------------------------------------------------------
def coords_grid(b, h, w):
    """Standard RAFT coords grid: (b, 2, h, w) with (x, y) channels."""
    ys, xs = jnp.meshgrid(jnp.arange(h), jnp.arange(w), indexing="ij")
    coords = jnp.stack([xs, ys], axis=0).astype(jnp.float32)
    return jnp.broadcast_to(coords[None], (b, 2, h, w))


def unfold3x3(x):
    """F.unfold(x, [3,3], padding=1) kept spatial: (N,C,H,W) -> (N, C*9, H, W).

    Output channel index = c*9 + ki*3 + kj (same ordering as torch unfold).
    Pure indexing / zero padding — data-movement glue, not compute.
    """
    N, C, H, W = x.shape
    xp = jnp.pad(x, ((0, 0), (0, 0), (1, 1), (1, 1)))
    cols = []
    for ki in range(3):
        for kj in range(3):
            cols.append(xp[:, :, ki:ki + H, kj:kj + W])
    u = jnp.stack(cols, axis=2)                # (N, C, 9, H, W)
    return u.reshape(N, C * 9, H, W)


# ----------------------------------------------------------------------------
# Tiling / VMEM helpers
# ----------------------------------------------------------------------------
def _spatial_tile(hw, max_tile, *, n_batch=1, min_steps=4):
    """Lane-dense spatial tile: full extent when tiny, else a multiple of 128.

    Shrinks the tile so the (n_batch, spatial) grid has at least `min_steps`
    steps (pipeline overlap depth / v7x megacore sharding), and prefers an
    exact divisor of hw so there is no padded edge block.
    """
    if hw <= 128:
        return hw                              # full-extent block (allowed)
    t = min(max_tile, hw)
    t -= t % 128
    t = max(t, 128)
    while t > 128 and n_batch * ((hw + t - 1) // t) < min_steps:
        t = max(128, (t // 2) - ((t // 2) % 128))
    for cand in range(t, 127, -128):           # prefer exact divisors
        if hw % cand == 0:
            return cand
    return t                                   # cdiv grid with padded edge block


def _mosaic_params(n_grid_axes, in_block_bytes, out_block_bytes, scratch_bytes=0):
    """Scoped-VMEM budget: double-buffered input/output blocks + in-kernel
    intermediates, 50% headroom, capped below v7x's 64 MiB physical VMEM."""
    need = 2 * in_block_bytes + 2 * out_block_bytes + scratch_bytes
    limit = int(min(48 * 1024 * 1024, max(16 * 1024 * 1024, (3 * need) // 2)))
    return pltpu.CompilerParams(
        dimension_semantics=("parallel",) * n_grid_axes,
        vmem_limit_bytes=limit)


# ----------------------------------------------------------------------------
# Pallas kernels
# ----------------------------------------------------------------------------
def _ctx_split_kernel(cmap_ref, net_ref, inp_ref):
    """net = tanh(cmap[:, :128]); inp = relu(cmap[:, 128:]).

    Blocks are (1, C, T) with T a lane-dense spatial tile.
    """
    half = net_ref.shape[1]
    top = cmap_ref[0, :half, :].astype(jnp.float32)     # (half, T)
    bot = cmap_ref[0, half:, :].astype(jnp.float32)     # (half, T)
    net_ref[0] = jnp.tanh(top).astype(net_ref.dtype)
    inp_ref[0] = jnp.maximum(bot, 0.0).astype(inp_ref.dtype)


def _upsample_kernel(uf_ref, mask_ref, out_ref, *, scale, ss, chunk):
    """Convex-combination upsampling, one (batch, spatial tile) per grid step.

    uf_ref   : (1, 2*9, T)   3x3-unfolded flow, channel index = c*9 + k
    mask_ref : (1, 9*ss, T)  mask, channel index = k*ss + ij
    out_ref  : (1, 2*ss, T)  channel index = c*ss + ij

    ij-chunked: only (chunk, T) accumulators and one (chunk, T) exp value are
    live at a time (register-resident), exp is computed on the fly, and the
    softmax normalisation is a single exact reciprocal per chunk.
    """
    T = mask_ref.shape[-1]
    # 3x3-unfolded, scaled flow rows; small (18 x T) and kept resident.
    uf = uf_ref[0].astype(jnp.float32) * jnp.float32(scale)        # (18, T)

    for c0 in range(0, ss, chunk):                                 # static unroll
        cs = min(chunk, ss - c0)

        # pass 1: per-chunk running max over the 9 neighbours (softmax stability)
        m_max = mask_ref[0, c0:c0 + cs, :].astype(jnp.float32)     # k = 0
        for k in range(1, 9):
            r0 = k * ss + c0
            m_max = jnp.maximum(m_max,
                                mask_ref[0, r0:r0 + cs, :].astype(jnp.float32))

        # pass 2: on-the-fly exp + register-resident accumulation
        denom = jnp.zeros((cs, T), jnp.float32)
        acc_x = jnp.zeros((cs, T), jnp.float32)
        acc_y = jnp.zeros((cs, T), jnp.float32)
        for k in range(9):                                         # static unroll
            r0 = k * ss + c0
            ek = jnp.exp(mask_ref[0, r0:r0 + cs, :].astype(jnp.float32) - m_max)
            denom = denom + ek
            acc_x = acc_x + ek * uf[k][None, :]                    # (1,T) sublane bcast
            acc_y = acc_y + ek * uf[9 + k][None, :]

        # Deferred, exact softmax normalisation (negligible vs. 9*cs*T exps).
        inv = pl.reciprocal(denom, approx=False)
        out_ref[0, c0:c0 + cs, :] = (acc_x * inv).astype(out_ref.dtype)
        out_ref[0, ss + c0:ss + c0 + cs, :] = (acc_y * inv).astype(out_ref.dtype)


# ----------------------------------------------------------------------------
# Wrappers
# ----------------------------------------------------------------------------
def ctx_split_pallas(cmap, *, max_tile=2048):
    # TODO(synk): ideally fused into the cnet epilogue (ExtractorC is undefined
    # in the provided source), which would remove this extra HBM round trip.
    N, C, Hs, Ws = cmap.shape
    half = C // 2
    hw = Hs * Ws
    x = cmap.reshape(N, C, hw)                         # lane-dense: spatial on lanes
    tile = _spatial_tile(hw, max_tile, n_batch=N, min_steps=4)
    grid = (N, (hw + tile - 1) // tile)
    itemsize = np.dtype(cmap.dtype).itemsize
    in_bytes = C * tile * itemsize
    out_bytes = 2 * half * tile * itemsize
    scratch = C * tile * 4                             # f32 casts of the two halves

    net, inp = pl.pallas_call(
        _ctx_split_kernel,
        out_shape=(jax.ShapeDtypeStruct((N, half, hw), cmap.dtype),
                   jax.ShapeDtypeStruct((N, half, hw), cmap.dtype)),
        grid=grid,
        in_specs=[pl.BlockSpec((1, C, tile), lambda n, s: (n, 0, s))],
        out_specs=(pl.BlockSpec((1, half, tile), lambda n, s: (n, 0, s)),
                   pl.BlockSpec((1, half, tile), lambda n, s: (n, 0, s))),
        compiler_params=_mosaic_params(2, in_bytes, out_bytes, scratch),
    )(x)
    return net.reshape(N, half, Hs, Ws), inp.reshape(N, half, Hs, Ws)


def upsample_flow_pallas(flow, mask, scale=8, *, max_tile=1024, chunk=8,
                         stream_dtype=jnp.bfloat16):
    """[N,2,Hs,Ws] + [N,9*scale*scale,Hs,Ws] -> [N,2,scale*Hs,scale*Ws].

    stream_dtype: dtype of the uf/mask HBM streams.  The mask is 576 of the
    722 input channels, so bf16 halves the dominant HBM traffic; compute stays
    f32 and the output dtype follows `flow`.  stream_dtype=None keeps the
    caller-provided dtypes.
    """
    N, _, Hs, Ws = flow.shape
    ss = scale * scale
    hw = Hs * Ws

    # TODO(synk): the 3x3 unfold could be folded into the kernel via pltpu.roll
    # on a haloed 2-D spatial block; kept as XLA glue since flow is 2 channels.
    uf = unfold3x3(flow).reshape(N, 18, hw)            # (N, 18, HW) lane-dense
    m = mask.reshape(N, 9 * ss, hw)                    # (N, 9*ss, HW) lane-dense
    if stream_dtype is not None:
        uf = uf.astype(stream_dtype)
        m = m.astype(stream_dtype)

    tile = _spatial_tile(hw, max_tile, n_batch=N, min_steps=4)
    grid = (N, (hw + tile - 1) // tile)
    in_bytes = (18 * uf.dtype.itemsize + 9 * ss * m.dtype.itemsize) * tile
    out_bytes = 2 * ss * tile * np.dtype(flow.dtype).itemsize
    scratch = (18 + 6 * chunk) * tile * 4              # resident uf + chunk accumulators

    out = pl.pallas_call(
        functools.partial(_upsample_kernel, scale=scale, ss=ss, chunk=chunk),
        out_shape=jax.ShapeDtypeStruct((N, 2 * ss, hw), flow.dtype),
        grid=grid,
        in_specs=[pl.BlockSpec((1, 18, tile), lambda n, s: (n, 0, s)),
                  pl.BlockSpec((1, 9 * ss, tile), lambda n, s: (n, 0, s))],
        out_specs=pl.BlockSpec((1, 2 * ss, tile), lambda n, s: (n, 0, s)),
        compiler_params=_mosaic_params(2, in_bytes, out_bytes, scratch),
    )(uf, m)

    # pixel-shuffle style rearrangement (pure layout plumbing)
    # TODO(synk): a consumer that accepts the (N, 2*ss, Hs*Ws) layout could skip
    # this extra XLA HBM pass.
    out = out.reshape(N, 2, scale, scale, Hs, Ws)      # (N, c, i, j, H, W)
    out = jnp.transpose(out, (0, 1, 4, 2, 5, 3))       # (N, c, H, i, W, j)
    return out.reshape(N, 2, scale * Hs, scale * Ws)


# ----------------------------------------------------------------------------
# Pure-JAX reference of TMA.upsample_flow (for correctness checks)
# ----------------------------------------------------------------------------
def upsample_flow_ref(flow, mask, scale=8):
    flow = flow.astype(jnp.float32)
    mask = mask.astype(jnp.float32)
    N, _, H, W = flow.shape
    m = mask.reshape(N, 1, 9, scale, scale, H, W)
    m = jax.nn.softmax(m, axis=2)
    uf = unfold3x3(scale * flow).reshape(N, 2, 9, 1, 1, H, W)
    up = jnp.sum(m * uf, axis=2)
    up = jnp.transpose(up, (0, 1, 4, 2, 5, 3))
    return up.reshape(N, 2, scale * H, scale * W)


# ----------------------------------------------------------------------------
# Demo / test
# ----------------------------------------------------------------------------
if __name__ == "__main__":
    key = jax.random.PRNGKey(0)
    b, bins, H, W = 2, 15, 256, 256                    # input_bins=15, split=5
    k1, k2, k3, k4, k5 = jax.random.split(key, 5)

    # Event voxel grids (shape fidelity with TMA.forward inputs)
    x1 = jax.random.normal(k1, (b, bins, H, W), jnp.float32)
    x2 = jax.random.normal(k2, (b, bins, H, W), jnp.float32)
    _, _, h, w = x2.shape
    Hs, Ws = h // 8, w // 8                            # 32 x 32 -> HW = 1024

    # TODO(synk): stand-ins for outputs of the undefined backbone modules
    # (cnet -> cmap, UpdateBlock -> dflow/upmask); deterministic from PRNGKey(0).
    cmap = jax.random.normal(k3, (b, 256, Hs, Ws), jnp.float32)
    upmask = jax.random.normal(k4, (b, 9 * 8 * 8, Hs, Ws), jnp.float32)
    dflow = 2.0 * jax.random.normal(k5, (b, 2, Hs, Ws), jnp.float32)

    coords0 = coords_grid(b, Hs, Ws)
    coords1 = coords0 + dflow
    flow = coords1 - coords0

    # --- Pallas kernels ------------------------------------------------------
    net, inp = ctx_split_pallas(cmap)
    flow_up_f32 = upsample_flow_pallas(flow, upmask, stream_dtype=jnp.float32)
    flow_up_bf16s = upsample_flow_pallas(flow, upmask)          # default: bf16 streams
    flow_bf = flow.astype(jnp.bfloat16)
    mask_bf = upmask.astype(jnp.bfloat16)
    flow_up_bf16 = upsample_flow_pallas(flow_bf, mask_bf)       # bf16 in -> bf16 out
    jax.block_until_ready((net, inp, flow_up_f32, flow_up_bf16s, flow_up_bf16))

    # --- Correctness vs. pure-JAX references of the PyTorch semantics --------
    np.testing.assert_allclose(np.asarray(net), np.tanh(np.asarray(cmap[:, :128])),
                               rtol=1e-5, atol=1e-5)
    np.testing.assert_allclose(np.asarray(inp),
                               np.maximum(np.asarray(cmap[:, 128:]), 0.0),
                               rtol=1e-5, atol=1e-5)

    # f32 streams, exact reciprocal -> tight agreement.
    ref_f32 = upsample_flow_ref(flow, upmask)
    np.testing.assert_allclose(np.asarray(flow_up_f32), np.asarray(ref_f32),
                               rtol=1e-5, atol=1e-4)

    # bf16-stream path: compare against exact f32 math on the same bf16-quantised
    # operands (quantisation commutes with unfold and with the power-of-two scale).
    flow_q = flow.astype(jnp.bfloat16).astype(jnp.float32)
    mask_q = upmask.astype(jnp.bfloat16).astype(jnp.float32)
    ref_q = upsample_flow_ref(flow_q, mask_q)
    np.testing.assert_allclose(np.asarray(flow_up_bf16s), np.asarray(ref_q),
                               rtol=1e-5, atol=1e-4)

    # bf16-in / bf16-out (dtype preserving); tolerance covers the final bf16 store.
    np.testing.assert_allclose(np.asarray(flow_up_bf16.astype(jnp.float32)),
                               np.asarray(ref_q), rtol=1e-2, atol=1e-2)

    assert flow_up_f32.shape == (b, 2, h, w)
    assert flow_up_bf16.dtype == jnp.bfloat16
    print("KERNEL_OK")
</pallas_src>

<mosaic_0001>
module attributes {stable_mosaic.version = 11 : i64} {
  func.func @_ctx_split_kernel(%arg0: i32, %arg1: i32, %arg2: memref<1x256x512xf32, #tpu.memory_space<vmem>>, %arg3: memref<1x128x512xf32, #tpu.memory_space<vmem>>, %arg4: memref<1x128x512xf32, #tpu.memory_space<vmem>>) attributes {dimension_semantics = [#tpu.dimension_semantics<parallel>, #tpu.dimension_semantics<parallel>], iteration_bounds = array<i64: 2, 2>, scalar_prefetch = 0 : i64, scratch_operands = 0 : i64, tpu.core_type = #tpu.core_type<tc>, window_params = [{transform_indices = @transform_0, window_bounds = array<i64: 1, 256, 512>}, {transform_indices = @transform_1, window_bounds = array<i64: 1, 128, 512>}, {transform_indices = @transform_2, window_bounds = array<i64: 1, 128, 512>}]} {
    %c0 = arith.constant 0 : index
    %c0_0 = arith.constant 0 : index
    %c0_1 = arith.constant 0 : index
    %0 = vector.load %arg2[%c0, %c0_0, %c0_1] : memref<1x256x512xf32, #tpu.memory_space<vmem>>, vector<1x128x512xf32>
    %1 = vector.shape_cast %0 : vector<1x128x512xf32> to vector<128x512xf32>
    %c0_2 = arith.constant 0 : index
    %c128 = arith.constant 128 : index
    %c0_3 = arith.constant 0 : index
    %2 = vector.load %arg2[%c0_2, %c128, %c0_3] : memref<1x256x512xf32, #tpu.memory_space<vmem>>, vector<1x128x512xf32>
    %3 = vector.shape_cast %2 : vector<1x128x512xf32> to vector<128x512xf32>
    %4 = math.tanh %1 : vector<128x512xf32>
    %c0_4 = arith.constant 0 : index
    %c0_5 = arith.constant 0 : index
    %c0_6 = arith.constant 0 : index
    %5 = vector.load %arg3[%c0_4, %c0_5, %c0_6] : memref<1x128x512xf32, #tpu.memory_space<vmem>>, vector<1x128x512xf32>
    %6 = vector.shape_cast %5 : vector<1x128x512xf32> to vector<128x512xf32>
    %7 = vector.shape_cast %4 : vector<128x512xf32> to vector<1x128x512xf32>
    tpu.vector_store %arg3[%c0_4, %c0_5, %c0_6], %7 {strides = array<i32>} : memref<1x128x512xf32, #tpu.memory_space<vmem>>, vector<1x128x512xf32>,
    %cst = arith.constant 0.000000e+00 : f32
    %8 = vector.broadcast %cst : f32 to vector<128x512xf32>
    %9 = arith.maximumf %3, %8 : vector<128x512xf32>
    %c0_7 = arith.constant 0 : index
    %c0_8 = arith.constant 0 : index
    %c0_9 = arith.constant 0 : index
    %10 = vector.load %arg4[%c0_7, %c0_8, %c0_9] : memref<1x128x512xf32, #tpu.memory_space<vmem>>, vector<1x128x512xf32>
    %11 = vector.shape_cast %10 : vector<1x128x512xf32> to vector<128x512xf32>
    %12 = vector.shape_cast %9 : vector<128x512xf32> to vector<1x128x512xf32>
    tpu.vector_store %arg4[%c0_7, %c0_8, %c0_9], %12 {strides = array<i32>} : memref<1x128x512xf32, #tpu.memory_space<vmem>>, vector<1x128x512xf32>,
    return
  }
  func.func @transform_0(%arg0: i32, %arg1: i32) -> (i32, i32, i32) {
    %c0_i32 = arith.constant 0 : i32
    %c0_i32_0 = arith.constant 0 : i32
    return %arg0, %c0_i32, %arg1 : i32, i32, i32
  }
  func.func @transform_1(%arg0: i32, %arg1: i32) -> (i32, i32, i32) {
    %c0_i32 = arith.constant 0 : i32
    %c0_i32_0 = arith.constant 0 : i32
    return %arg0, %c0_i32, %arg1 : i32, i32, i32
  }
  func.func @transform_2(%arg0: i32, %arg1: i32) -> (i32, i32, i32) {
    %c0_i32 = arith.constant 0 : i32
    %c0_i32_0 = arith.constant 0 : i32
    return %arg0, %c0_i32, %arg1 : i32, i32, i32
  }
}

</mosaic_0001>

<bundles_post_ra>
// kernel: tpu_custom_call.1
= control target key start
LH: loop header
LB: loop body
LE: loop exit
PB: predicated region body
PF: predicated region fallthrough
CT: control target
= control target key end

     0   :  { %8 = vsyncpa [#allocation3], 0  ;;  %s1714_s0 = inlined_call_operand.hbm [shape: f32[2,256,1024], index: 0, kind: input, shape index: {}]   ;;  %s1715_s1 = inlined_call_operand.hbm [shape: f32[2,128,1024], index: 1, kind: output, shape index: {0}]   ;;  %s1716_s2 = inlined_call_operand.hbm [shape: f32[2,128,1024], index: 2, kind: output, shape index: {1}]  }
   0x1   :  { %10 = vsyncpa [#allocation3 + $0x1], 0 }
   0x2   :  { %11 = vsyncpa [#allocation4], 0 }
   0x3   :  { %13 = vsyncpa [#allocation4 + $0x1], 0 }
   0x4   :  { %14 = vsyncpa [#allocation7], 0 }
   0x5   :  { %16 = vsyncpa [#allocation7 + $0x1], 0  ;;  %s1169_s9 = smov 0   ;;  %s1171_s10 = smov 0  }
   0x6   :  { %s1173_s11 = smov 0   ;;  %s1175_s12 = smov 0  }
   0x7   :  { %s1177_s13 = smov 0   ;;  %s1179_s14 = smov 0  }
   0x8   :  { %s1181_s15 = smov 0   ;;  %s1183_s16 = smov 0  }
   0x9 LB: > { %s744_s17 = sadd.s32 4294967295, %s1143_s16   ;;  %s745_s18 = sadd.s32 4294967294, %s1143_s16   ;;  %s1143_s16 = sphi %s1183_s16, %s22_s16   ;;  %s1139_s15 = sphi %s1181_s15, %s1732_s15   ;;  %s1135_s14 = sphi %s1179_s14, %s1731_s14   ;;  %s1131_s13 = sphi %s1177_s13, %s1730_s13   ;;  %s1127_s12 = sphi %s1175_s12, %s1729_s12   ;;  %s1123_s11 = sphi %s1173_s11, %s1728_s11   ;;  %s1119_s10 = sphi %s1171_s10, %s1727_s10   ;;  %s1115_s9 = sphi %s1169_s9, %s1726_s9  }
   0xa   : > { %s31_s19 = sadd.s32 1, %s1135_s14  ;;  %s34_s20 = sadd.s32 1, %s1139_s15 }
   0xb   : > { %p32_p0 = scmp.ge.s32.totalorder %s31_s19, 2  ;;  %s43_s21 = sadd.s32 1, %s1123_s11 }
   0xc   : > { %p50_p1 = scmp.ne.s32.totalorder %s1123_s11, %s1119_s10  ;;  %p51_p2 = scmp.eq.s32.totalorder %s1143_s16, 0 }
   0xd   : > { %s1734_s19 = smov (%p32_p0, %s31_s19), 0  ;;  %s1736_s20 = smov (!%p32_p0, %s34_s20), %s1139_s15 }
   0xe   : > { %s39_s22 = ssub.s32 %s1135_s14, %s1734_s19  ;;  %p1222_p3 = por %p51_p2, %p50_p1 }
   0xf   : > { %p36_p4 = scmp.ge.s32.totalorder %s1736_s20, 2  ;;  %p56_p5 = scmp.ne.s32.totalorder %s1119_s10, %s1115_s9 }
  0x10   : > { %p57_p6 = scmp.eq.s32.totalorder %s744_s17, 0  ;;  %p82_p7 = scmp.eq.s32.totalorder %s744_s17, 3 }
  0x11   : > { %s1738_s20 = smov (%p36_p4, %s1736_s20), 0  ;;  %p88_p10 = scmp.eq.s32.totalorder %s745_s18, 3 }
  0x12   : > { %p1230_p8 = por %p57_p6, %p56_p5  ;;  %p1234_p9 = por %p82_p7, %p50_p1 }
  0x13   : > { %s38_s26 = ssub.s32 %s1139_s15, %s1738_s20  ;;  %p1240_p12 = por %p88_p10, %p56_p5 }
  0x14   : > { %s1720_s25 = scalar_select %p1234_p9, 1, 0 }
  0x15   : > { %s40_s27 = sor.u32 %s39_s22, %s38_s26  ;;  %p783_p13 = scmp.lt.s32.totalorder %s1143_s16, 4 }
  0x16   : > { %p41_p11 = scmp.eq.s32.totalorder %s40_s27, 0  ;;  %s136_s29 = sand.u32 1, %s1123_s11  }
  0x17   : > { %s1721_s28 = scalar_select %p1240_p12, 1, 0 }
  0x18   : > { %s1247_s30 = scalar_select %p41_p11, %s1123_s11, %s43_s21  }
  0x19   : > { %s748_s3 = sshll.u32 %s136_s29, 10  ;;  %s749_s4 = sshll.u32 %s1135_s14, 2 }
  0x1a   : > { %s750_s5 = sshll.u32 %s1139_s15, 8  ;;  %s140_s6 = scalar_lea.vmem [#allocation2], %s748_s3 }
  0x1b   : > { %s149_s7 = sshll.u32 %s140_s6, 4  ;;  %s146_s8 = sadd.s32 %s750_s5, %s749_s4  ;;  %s1251_s7 = int_to_ptr.vmem [resolvable:$true] %s149_s7 }
  0x1c   : > { %s751_s17 = sshll.u32 %s146_s8, 7  ;;  %p1255_p0 = pnand %p783_p13, %p1222_p3 }
  0x1d   : > { %s1262_s21 = scalar_lea.hbm %s1714_s0, %s751_s17  ;;  %s1265_s27 = scalar_lea.sflag [#allocation3], %s136_s29 }
  0x1e   : > { %s983_s3 = scalar_lea.hbm %s1262_s21, 16384  ;;  %p985_p3 = pneg %p1255_p0 }
  0x1f   : > { %p984_p2 = scmp.ne.s32.totalorder %s1262_s21, %s983_s3  ;;  %s988_s5 = scalar_lea.hbm %s1714_s0, 65536 }
  0x20   : > { %p989_p6 = scmp.lt.u32.totalorder %s1262_s21, %s1714_s0  ;;  %p990_p7 = scmp.lt.u32.totalorder %s988_s5, %s983_s3 }
  0x21   : > { %p986_p4 = pnand %p985_p3, %p984_p2  ;;  %p992_p11 = scmp.lt.u32.totalorder %s983_s3, %s1262_s21 }
  0x22   : > { %p991_p10 = por %p990_p7, %p989_p6 }
  0x23   : > { %p987_p5 = pneg %p986_p4 }
  0x24   : > { %p993_p13 = por %p992_p11, %p991_p10 }
  0x26   : > { %p994_p1 = pnand %p993_p13, %p987_p5 }
  0x28   : > { %997 = shalt.err (!%p994_p1)
}
  0x29   : > { %s998_s29 = scalar_lea.vmem %s1251_s7, 16384  ;;  %s1145_s17 = smov [#allocation2]  }
  0x2a   : > { %p999_p2 = scmp.ne.s32.totalorder %s1251_s7, %s998_s29  ;;  %s1003_s22 = sshll.u32 %s1145_s17, 4  ;;  %s1004_s22 = int_to_ptr.vmem [resolvable:$false] %s1003_s22 }
  0x2b   : > { %s1005_s26 = scalar_lea.vmem %s1004_s22, 32768  ;;  %p1006_p9 = scmp.lt.s32.totalorder %s1251_s7, %s1004_s22 }
  0x2c   : > { %p1001_p4 = pnand %p999_p2, %p985_p3  ;;  %p1007_p6 = scmp.lt.s32.totalorder %s1005_s26, %s998_s29 }
  0x2e   : > { %p1002_p12 = pneg %p1001_p4  ;;  %p1008_p7 = por %p1007_p6, %p1006_p9 }
  0x30   : > { %p1009_p10 = pnand %p1008_p7, %p1002_p12 }
  0x32   : > { %1012 = shalt.err (!%p1009_p10)
}
  0x33   : > { %s1146_s3 = smov 1024   ;;  %s1147_s23 = smov 512  }
  0x34   : > { %s1148_s4 = smov 32   ;;  %p157_p1 = scmp.lt.s32.totalorder %s1143_s16, 5 }
  0x35   : > { %775 = dma.hbm_to_vmem [thread:$0]  (!%p1255_p0), %s1262_s21, 16384, %s1251_s7, %s1265_s27, %s1146_s3, %s1147_s23, %s1148_s4  }
  0x36   : > { %p1723_p3 = scmp.ge.s32.totalorder %s1143_s16, 1 }
  0x38   : > { %p158_p5 = pnand %p1723_p3, %p157_p1 }
  0x39   : > { %s1297_s5 = sand.u32 (!%p158_p5), 1, %s1119_s10  }
  0x3a   : > { %161 = sbr.rel (%p158_p5) target bundleno = 182 (0xb6), region = 24  ;;  %s753_s6 = sshll.u32 (!%p158_p5), %s1297_s5, 10 }
  0x3b   : > { %s164_s8 = scalar_lea.sflag (!%p158_p5), [#allocation3], %s1297_s5  ;;  %s1301_s29 = scalar_lea.vmem (!%p158_p5), [#allocation2], %s753_s6 }
  0x41   : > { %1102 = dma.done.wait (%p1230_p8), %s164_s8, 16384  }
  0x42   : > { %1104 = vsyncadd (%p1230_p8), %s164_s8, 4294950912  ;;  %v196_v0 = vld [vmem:[%s1301_s29] sm:$0xff]  ;;  %v197_v1 = vld [vmem:[%s1301_s29 + $0x8] sm:$0xff]  ;;  %s754_s24 = sshll.u32 %s1297_s5, 9  ;;  %s758_s18 = sshll.u32 %s1127_s12, 2 }
  0x43   : > { %v198_v2 = vld [vmem:[%s1301_s29 + $0x10] sm:$0xff]  ;;  %855 = vtanh.f32 %v196_v0  ;;  %v199_v3 = vld [vmem:[%s1301_s29 + $0x18] sm:$0xff]  ;;  %v200_v4 = vld [vmem:[%s1301_s29 + $0x20] sm:$0xff]  ;;  %s1324_s7 = scalar_lea.vmem [#allocation5], %s754_s24  ;;  %s759_s21 = sshll.u32 %s1131_s13, 7 }
  0x44   : > { %857 = vtanh.f32 %v197_v1  ;;  %v201_v5 = vld [vmem:[%s1301_s29 + $0x28] sm:$0xff]  ;;  %v202_v6 = vld [vmem:[%s1301_s29 + $0x30] sm:$0xff]  ;;  %v203_v7 = vld [vmem:[%s1301_s29 + $0x38] sm:$0xff]  ;;  %s1338_s12 = sadd.s32 %s759_s21, %s758_s18  ;;  %s1362_s27 = scalar_lea.vmem [#allocation6], %s754_s24 }
  0x45   : > { %859 = vtanh.f32 %v198_v2  ;;  %v204_v8 = vld [vmem:[%s1301_s29 + $0x40] sm:$0xff]  ;;  %v205_v9 = vld [vmem:[%s1301_s29 + $0x48] sm:$0xff]  ;;  %v206_v10 = vld [vmem:[%s1301_s29 + $0x50] sm:$0xff]  ;;  %s760_s13 = sshll.u32 %s1338_s12, 7  ;;  %s619_s17 = sshll.u32 %s1362_s27, 4  ;;  %s1565_s17 = int_to_ptr.vmem [resolvable:$true] %s619_s17 }
  0x46   : > { %861 = vtanh.f32 %v199_v3  ;;  %v207_v11 = vld [vmem:[%s1301_s29 + $0x58] sm:$0xff]  ;;  %v208_v12 = vld [vmem:[%s1301_s29 + $0x60] sm:$0xff]  ;;  %v209_v14 = vld [vmem:[%s1301_s29 + $0x68] sm:$0xff]  ;;  %s1561_s3 = scalar_lea.hbm %s1716_s2, %s760_s13  ;;  %s586_s23 = scalar_lea.sflag [#allocation7], %s1297_s5 }
  0x47   : > { %863 = vtanh.f32 %v200_v4  ;;  %v210_v16 = vld [vmem:[%s1301_s29 + $0x70] sm:$0xff]  ;;  %v211_v18 = vld [vmem:[%s1301_s29 + $0x78] sm:$0xff]  ;;  %v212_v20 = vld [vmem:[%s1301_s29 + $0x80] sm:$0xff]  ;;  %s1013_s4 = scalar_lea.vmem %s1565_s17, 8192  ;;  %p1724_p9 = scmp.ne.s32.totalorder %s1720_s25, 0 }
  0x48   : > { %865 = vtanh.f32 %v201_v5  ;;  %v213_v22 = vld [vmem:[%s1301_s29 + $0x88] sm:$0xff]  ;;  %v214_v24 = vld [vmem:[%s1301_s29 + $0x90] sm:$0xff]  ;;  %v215_v26 = vld [vmem:[%s1301_s29 + $0x98] sm:$0xff]  ;;  %p1014_p8 = scmp.ne.s32.totalorder %s1565_s17, %s1013_s4  ;;  %s1149_s6 = smov [#allocation6]  }
  0x49   : > { %867 = vtanh.f32 %v202_v6  ;;  %v216_v28 = vld [vmem:[%s1301_s29 + $0xa0] sm:$0xff]  ;;  %v217_v30 = vld [vmem:[%s1301_s29 + $0xa8] sm:$0xff]  ;;  %v218_v32 = vld [vmem:[%s1301_s29 + $0xb0] sm:$0xff]  ;;  %s1017_s8 = sshll.u32 %s1149_s6, 4  ;;  %s1018_s8 = int_to_ptr.vmem [resolvable:$false] %s1017_s8 }
  0x4a   : > { %869 = vtanh.f32 %v203_v7  ;;  %v219_v33 = vld [vmem:[%s1301_s29 + $0xb8] sm:$0xff]  ;;  %v220_v34 = vld [vmem:[%s1301_s29 + $0xc0] sm:$0xff]  ;;  %v221_v36 = vld [vmem:[%s1301_s29 + $0xc8] sm:$0xff]  ;;  %p1015_p12 = pnand %p1014_p8, %p1724_p9  ;;  %s1019_s24 = scalar_lea.vmem %s1018_s8, 16384 }
  0x4b   : > { %871 = vtanh.f32 %v204_v8  ;;  %v260_v37 = vld [vmem:[%s1301_s29 + $0x200] sm:$0xff]  ;;  %v261_v38 = vld [vmem:[%s1301_s29 + $0x208] sm:$0xff]  ;;  %v222_v40 = vld [vmem:[%s1301_s29 + $0xd0] sm:$0xff]  ;;  %p1020_p11 = scmp.lt.s32.totalorder %s1565_s17, %s1018_s8  ;;  %p1021_p13 = scmp.lt.s32.totalorder %s1019_s24, %s1013_s4 }
  0x4c   : > { %873 = vtanh.f32 %v205_v9  ;;  %v452_v41 = vmax.f32 %v260_v37, 0.0  ;;  %v453_v42 = vmax.f32 %v261_v38, 0.0  ;;  %v262_v43 = vld [vmem:[%s1301_s29 + $0x210] sm:$0xff]  ;;  %v263_v44 = vld [vmem:[%s1301_s29 + $0x218] sm:$0xff]  ;;  %v264_v45 = vld [vmem:[%s1301_s29 + $0x220] sm:$0xff]  ;;  %p1016_p0 = pneg %p1015_p12 }
  0x4d   : > { %v856_v13 = vpop.eup %855  ;;  %875 = vtanh.f32 %v206_v10  ;;  %v223_v47 = vld [vmem:[%s1301_s29 + $0xd8] sm:$0xff]  ;;  %v454_v48 = vmax.f32 %v262_v43, 0.0  ;;  %v455_v49 = vmax.f32 %v263_v44, 0.0  ;;  %v456_v50 = vmax.f32 %v264_v45, 0.0  ;;  %v265_v51 = vld [vmem:[%s1301_s29 + $0x228] sm:$0xff]  ;;  %v266_v52 = vld [vmem:[%s1301_s29 + $0x230] sm:$0xff]  ;;  %p1022_p2 = por %p1021_p13, %p1020_p11 }
  0x4e   : > { %v858_v15 = vpop.eup %857  ;;  %388 = vst [vmem:[%s1324_s7] sm:$0xff] %v856_v13  ;;  %877 = vtanh.f32 %v207_v11  ;;  %v267_v53 = vld [vmem:[%s1301_s29 + $0x238] sm:$0xff]  ;;  %v224_v55 = vld [vmem:[%s1301_s29 + $0xe0] sm:$0xff]  ;;  %516 = vst [vmem:[%s1362_s27] sm:$0xff] %v452_v41  ;;  %v457_v56 = vmax.f32 %v265_v51, 0.0  ;;  %v458_v57 = vmax.f32 %v266_v52, 0.0 }
  0x4f   : > { %v860_v17 = vpop.eup %859  ;;  %389 = vst [vmem:[%s1324_s7 + $0x8] sm:$0xff] %v858_v15  ;;  %879 = vtanh.f32 %v208_v12  ;;  %517 = vst [vmem:[%s1362_s27 + $0x8] sm:$0xff] %v453_v42  ;;  %v459_v58 = vmax.f32 %v267_v53, 0.0  ;;  %v268_v59 = vld [vmem:[%s1301_s29 + $0x240] sm:$0xff]  ;;  %v269_v60 = vld [vmem:[%s1301_s29 + $0x248] sm:$0xff]  ;;  %p1023_p4 = pnand %p1022_p2, %p1016_p0 }
  0x50   : > { %v862_v19 = vpop.eup %861  ;;  %390 = vst [vmem:[%s1324_s7 + $0x10] sm:$0xff] %v860_v17  ;;  %881 = vtanh.f32 %v209_v14  ;;  %v270_v61 = vld [vmem:[%s1301_s29 + $0x250] sm:$0xff]  ;;  %v1379_v63 = vld [vmem:[%s1301_s29 + $0xe8] sm:$0xff]  ;;  %518 = vst [vmem:[%s1362_s27 + $0x10] sm:$0xff] %v454_v48  ;;  %v460_v0 = vmax.f32 %v268_v59, 0.0  ;;  %v461_v1 = vmax.f32 %v269_v60, 0.0 }
  0x51   : > { %v864_v21 = vpop.eup %863  ;;  %391 = vst [vmem:[%s1324_s7 + $0x18] sm:$0xff] %v862_v19  ;;  %883 = vtanh.f32 %v210_v16  ;;  %519 = vst [vmem:[%s1362_s27 + $0x18] sm:$0xff] %v455_v49  ;;  %v462_v2 = vmax.f32 %v270_v61, 0.0  ;;  %v271_v3 = vld [vmem:[%s1301_s29 + $0x258] sm:$0xff]  ;;  %v272_v4 = vld [vmem:[%s1301_s29 + $0x260] sm:$0xff] }
  0x52   : > { %v866_v23 = vpop.eup %865  ;;  %392 = vst [vmem:[%s1324_s7 + $0x20] sm:$0xff] %v864_v21  ;;  %885 = vtanh.f32 %v211_v18  ;;  %520 = vst [vmem:[%s1362_s27 + $0x20] sm:$0xff] %v456_v50  ;;  %v273_v5 = vld [vmem:[%s1301_s29 + $0x268] sm:$0xff]  ;;  %v1389_v7 = vld [vmem:[%s1301_s29 + $0xf0] sm:$0xff]  ;;  %v463_v8 = vmax.f32 %v271_v3, 0.0  ;;  %v464_v9 = vmax.f32 %v272_v4, 0.0 }
  0x53   : > { %v868_v25 = vpop.eup %867  ;;  %393 = vst [vmem:[%s1324_s7 + $0x28] sm:$0xff] %v866_v23  ;;  %887 = vtanh.f32 %v212_v20  ;;  %521 = vst [vmem:[%s1362_s27 + $0x28] sm:$0xff] %v457_v56  ;;  %v465_v10 = vmax.f32 %v273_v5, 0.0  ;;  %v274_v11 = vld [vmem:[%s1301_s29 + $0x270] sm:$0xff]  ;;  %v275_v12 = vld [vmem:[%s1301_s29 + $0x278] sm:$0xff] }
  0x54   : > { %v870_v27 = vpop.eup %869  ;;  %394 = vst [vmem:[%s1324_s7 + $0x30] sm:$0xff] %v868_v25  ;;  %889 = vtanh.f32 %v213_v22  ;;  %522 = vst [vmem:[%s1362_s27 + $0x30] sm:$0xff] %v458_v57  ;;  %v276_v13 = vld [vmem:[%s1301_s29 + $0x280] sm:$0xff]  ;;  %v1399_v15 = vld [vmem:[%s1301_s29 + $0xf8] sm:$0xff]  ;;  %v466_v16 = vmax.f32 %v274_v11, 0.0  ;;  %v467_v17 = vmax.f32 %v275_v12, 0.0 }
  0x55   : > { %v872_v29 = vpop.eup %871  ;;  %395 = vst [vmem:[%s1324_s7 + $0x38] sm:$0xff] %v870_v27  ;;  %891 = vtanh.f32 %v214_v24  ;;  %523 = vst [vmem:[%s1362_s27 + $0x38] sm:$0xff] %v459_v58  ;;  %v468_v18 = vmax.f32 %v276_v13, 0.0  ;;  %v277_v19 = vld [vmem:[%s1301_s29 + $0x288] sm:$0xff]  ;;  %v278_v20 = vld [vmem:[%s1301_s29 + $0x290] sm:$0xff] }
  0x56   : > { %v874_v31 = vpop.eup %873  ;;  %396 = vst [vmem:[%s1324_s7 + $0x40] sm:$0xff] %v872_v29  ;;  %893 = vtanh.f32 %v215_v26  ;;  %524 = vst [vmem:[%s1362_s27 + $0x40] sm:$0xff] %v460_v0  ;;  %v279_v21 = vld [vmem:[%s1301_s29 + $0x298] sm:$0xff]  ;;  %v1409_v23 = vld [vmem:[%s1301_s29 + $0x100] sm:$0xff]  ;;  %v469_v24 = vmax.f32 %v277_v19, 0.0  ;;  %v470_v25 = vmax.f32 %v278_v20, 0.0 }
  0x57   : > { %v876_v35 = vpop.eup %875  ;;  %397 = vst [vmem:[%s1324_s7 + $0x48] sm:$0xff] %v874_v31  ;;  %895 = vtanh.f32 %v216_v28  ;;  %525 = vst [vmem:[%s1362_s27 + $0x48] sm:$0xff] %v461_v1  ;;  %v471_v26 = vmax.f32 %v279_v21, 0.0  ;;  %v280_v27 = vld [vmem:[%s1301_s29 + $0x2a0] sm:$0xff]  ;;  %v281_v28 = vld [vmem:[%s1301_s29 + $0x2a8] sm:$0xff] }
  0x58   : > { %v878_v39 = vpop.eup %877  ;;  %398 = vst [vmem:[%s1324_s7 + $0x50] sm:$0xff] %v876_v35  ;;  %897 = vtanh.f32 %v217_v30  ;;  %526 = vst [vmem:[%s1362_s27 + $0x50] sm:$0xff] %v462_v2  ;;  %v282_v29 = vld [vmem:[%s1301_s29 + $0x2b0] sm:$0xff]  ;;  %v1419_v31 = vld [vmem:[%s1301_s29 + $0x108] sm:$0xff] }
  0x59   : > { %v880_v46 = vpop.eup %879  ;;  %399 = vst [vmem:[%s1324_s7 + $0x58] sm:$0xff] %v878_v39  ;;  %899 = vtanh.f32 %v218_v32  ;;  %527 = vst [vmem:[%s1362_s27 + $0x58] sm:$0xff] %v463_v8  ;;  %v472_v32 = vmax.f32 %v280_v27, 0.0  ;;  %v283_v35 = vld [vmem:[%s1301_s29 + $0x2b8] sm:$0xff]  ;;  %v285_v37 = vld [vmem:[%s1301_s29 + $0x2c8] sm:$0xff] }
  0x5a   : > { %v882_v54 = vpop.eup %881  ;;  %400 = vst [vmem:[%s1324_s7 + $0x60] sm:$0xff] %v880_v46  ;;  %901 = vtanh.f32 %v219_v33  ;;  %528 = vst [vmem:[%s1362_s27 + $0x60] sm:$0xff] %v464_v9  ;;  %v473_v33 = vmax.f32 %v281_v28, 0.0  ;;  %v1430_v39 = vld [vmem:[%s1301_s29 + $0x110] sm:$0xff]  ;;  %v477_v42 = vmax.f32 %v285_v37, 0.0  ;;  %v287_v44 = vld [vmem:[%s1301_s29 + $0x2d8] sm:$0xff] }
  0x5b   : > { %v884_v62 = vpop.eup %883  ;;  %401 = vst [vmem:[%s1324_s7 + $0x68] sm:$0xff] %v882_v54  ;;  %903 = vtanh.f32 %v220_v34  ;;  %529 = vst [vmem:[%s1362_s27 + $0x68] sm:$0xff] %v465_v10  ;;  %v474_v34 = vmax.f32 %v282_v29, 0.0  ;;  %v286_v43 = vld [vmem:[%s1301_s29 + $0x2d0] sm:$0xff]  ;;  %v288_v45 = vld [vmem:[%s1301_s29 + $0x2e0] sm:$0xff]  ;;  %v479_v49 = vmax.f32 %v287_v44, 0.0 }
  0x5c   : > { %v886_v6 = vpop.eup %885  ;;  %402 = vst [vmem:[%s1324_s7 + $0x70] sm:$0xff] %v884_v62  ;;  %905 = vtanh.f32 %v221_v36  ;;  %530 = vst [vmem:[%s1362_s27 + $0x70] sm:$0xff] %v466_v16  ;;  %v284_v36 = vld [vmem:[%s1301_s29 + $0x2c0] sm:$0xff]  ;;  %v478_v48 = vmax.f32 %v286_v43, 0.0  ;;  %v480_v50 = vmax.f32 %v288_v45, 0.0  ;;  %v289_v51 = vld [vmem:[%s1301_s29 + $0x2e8] sm:$0xff] }
  0x5d   : > { %v888_v14 = vpop.eup %887  ;;  %403 = vst [vmem:[%s1324_s7 + $0x78] sm:$0xff] %v886_v6  ;;  %907 = vtanh.f32 %v222_v40  ;;  %531 = vst [vmem:[%s1362_s27 + $0x78] sm:$0xff] %v467_v17  ;;  %v475_v40 = vmax.f32 %v283_v35, 0.0  ;;  %v476_v41 = vmax.f32 %v284_v36, 0.0  ;;  %v290_v52 = vld [vmem:[%s1301_s29 + $0x2f0] sm:$0xff]  ;;  %v291_v53 = vld [vmem:[%s1301_s29 + $0x2f8] sm:$0xff] }
  0x5e   : > { %v890_v22 = vpop.eup %889  ;;  %404 = vst [vmem:[%s1324_s7 + $0x80] sm:$0xff] %v888_v14  ;;  %909 = vtanh.f32 %v223_v47  ;;  %532 = vst [vmem:[%s1362_s27 + $0x80] sm:$0xff] %v468_v18  ;;  %v1441_v47 = vld [vmem:[%s1301_s29 + $0x118] sm:$0xff]  ;;  %v481_v56 = vmax.f32 %v289_v51, 0.0  ;;  %v482_v57 = vmax.f32 %v290_v52, 0.0  ;;  %v483_v58 = vmax.f32 %v291_v53, 0.0 }
  0x5f   : > { %v892_v30 = vpop.eup %891  ;;  %405 = vst [vmem:[%s1324_s7 + $0x88] sm:$0xff] %v890_v22  ;;  %911 = vtanh.f32 %v224_v55  ;;  %533 = vst [vmem:[%s1362_s27 + $0x88] sm:$0xff] %v469_v24  ;;  %v1452_v55 = vld [vmem:[%s1301_s29 + $0x120] sm:$0xff]  ;;  %v293_v60 = vld [vmem:[%s1301_s29 + $0x308] sm:$0xff] }
  0x60   : > { %v894_v38 = vpop.eup %893  ;;  %406 = vst [vmem:[%s1324_s7 + $0x90] sm:$0xff] %v892_v30  ;;  %913 = vtanh.f32 %v1379_v63  ;;  %534 = vst [vmem:[%s1362_s27 + $0x90] sm:$0xff] %v470_v25  ;;  %v292_v59 = vld [vmem:[%s1301_s29 + $0x300] sm:$0xff]  ;;  %v294_v61 = vld [vmem:[%s1301_s29 + $0x310] sm:$0xff]  ;;  %v485_v1 = vmax.f32 %v293_v60, 0.0 }
  0x61   : > { %535 = vst [vmem:[%s1362_s27 + $0x98] sm:$0xff] %v471_v26  ;;  %v896_v46 = vpop.eup %895  ;;  %407 = vst [vmem:[%s1324_s7 + $0x98] sm:$0xff] %v894_v38  ;;  %915 = vtanh.f32 %v1389_v7  ;;  %v1463_v63 = vld [vmem:[%s1301_s29 + $0x128] sm:$0xff]  ;;  %v484_v0 = vmax.f32 %v292_v59, 0.0  ;;  %v486_v2 = vmax.f32 %v294_v61, 0.0  ;;  %v295_v3 = vld [vmem:[%s1301_s29 + $0x318] sm:$0xff] }
  0x62   : > { %536 = vst [vmem:[%s1362_s27 + $0xa0] sm:$0xff] %v472_v32  ;;  %537 = vst [vmem:[%s1362_s27 + $0xa8] sm:$0xff] %v473_v33  ;;  %v898_v54 = vpop.eup %897  ;;  %917 = vtanh.f32 %v1399_v15  ;;  %v296_v4 = vld [vmem:[%s1301_s29 + $0x320] sm:$0xff]  ;;  %v297_v5 = vld [vmem:[%s1301_s29 + $0x328] sm:$0xff]  ;;  %v487_v8 = vmax.f32 %v295_v3, 0.0 }
  0x63   : > { %538 = vst [vmem:[%s1362_s27 + $0xb0] sm:$0xff] %v474_v34  ;;  %408 = vst [vmem:[%s1324_s7 + $0xa0] sm:$0xff] %v896_v46  ;;  %v900_v62 = vpop.eup %899  ;;  %919 = vtanh.f32 %v1409_v23  ;;  %v1474_v7 = vld [vmem:[%s1301_s29 + $0x130] sm:$0xff]  ;;  %v488_v9 = vmax.f32 %v296_v4, 0.0  ;;  %v489_v10 = vmax.f32 %v297_v5, 0.0  ;;  %v299_v12 = vld [vmem:[%s1301_s29 + $0x338] sm:$0xff] }
  0x64   : > { %539 = vst [vmem:[%s1362_s27 + $0xb8] sm:$0xff] %v475_v40  ;;  %540 = vst [vmem:[%s1362_s27 + $0xc0] sm:$0xff] %v476_v41  ;;  %v902_v6 = vpop.eup %901  ;;  %921 = vtanh.f32 %v1419_v31  ;;  %v298_v11 = vld [vmem:[%s1301_s29 + $0x330] sm:$0xff]  ;;  %v300_v13 = vld [vmem:[%s1301_s29 + $0x340] sm:$0xff]  ;;  %v491_v17 = vmax.f32 %v299_v12, 0.0 }
  0x65   : > { %541 = vst [vmem:[%s1362_s27 + $0xc8] sm:$0xff] %v477_v42  ;;  %409 = vst [vmem:[%s1324_s7 + $0xa8] sm:$0xff] %v898_v54  ;;  %v904_v14 = vpop.eup %903  ;;  %923 = vtanh.f32 %v1430_v39  ;;  %v1485_v15 = vld [vmem:[%s1301_s29 + $0x138] sm:$0xff]  ;;  %v490_v16 = vmax.f32 %v298_v11, 0.0  ;;  %v492_v18 = vmax.f32 %v300_v13, 0.0  ;;  %v301_v19 = vld [vmem:[%s1301_s29 + $0x348] sm:$0xff] }
  0x66   : > { %542 = vst [vmem:[%s1362_s27 + $0xd0] sm:$0xff] %v478_v48  ;;  %543 = vst [vmem:[%s1362_s27 + $0xd8] sm:$0xff] %v479_v49  ;;  %v302_v20 = vld [vmem:[%s1301_s29 + $0x350] sm:$0xff]  ;;  %v303_v21 = vld [vmem:[%s1301_s29 + $0x358] sm:$0xff]  ;;  %v906_v22 = vpop.eup %905  ;;  %925 = vtanh.f32 %v1441_v47  ;;  %v493_v24 = vmax.f32 %v301_v19, 0.0 }
  0x67   : > { %544 = vst [vmem:[%s1362_s27 + $0xe0] sm:$0xff] %v480_v50  ;;  %410 = vst [vmem:[%s1324_s7 + $0xb0] sm:$0xff] %v900_v62  ;;  %v236_v23 = vld [vmem:[%s1301_s29 + $0x140] sm:$0xff]  ;;  %v494_v25 = vmax.f32 %v302_v20, 0.0  ;;  %v495_v26 = vmax.f32 %v303_v21, 0.0  ;;  %v305_v28 = vld [vmem:[%s1301_s29 + $0x368] sm:$0xff]  ;;  %v908_v30 = vpop.eup %907  ;;  %927 = vtanh.f32 %v1452_v55 }
  0x68   : > { %545 = vst [vmem:[%s1362_s27 + $0xe8] sm:$0xff] %v481_v56  ;;  %546 = vst [vmem:[%s1362_s27 + $0xf0] sm:$0xff] %v482_v57  ;;  %v304_v27 = vld [vmem:[%s1301_s29 + $0x360] sm:$0xff]  ;;  %v306_v29 = vld [vmem:[%s1301_s29 + $0x370] sm:$0xff]  ;;  %v497_v33 = vmax.f32 %v305_v28, 0.0  ;;  %v910_v38 = vpop.eup %909  ;;  %929 = vtanh.f32 %v1463_v63 }
  0x69   : > { %547 = vst [vmem:[%s1362_s27 + $0xf8] sm:$0xff] %v483_v58  ;;  %411 = vst [vmem:[%s1324_s7 + $0xb8] sm:$0xff] %v902_v6  ;;  %v237_v31 = vld [vmem:[%s1301_s29 + $0x148] sm:$0xff]  ;;  %v496_v32 = vmax.f32 %v304_v27, 0.0  ;;  %v498_v34 = vmax.f32 %v306_v29, 0.0  ;;  %v307_v35 = vld [vmem:[%s1301_s29 + $0x378] sm:$0xff]  ;;  %v912_v46 = vpop.eup %911  ;;  %931 = vtanh.f32 %v1474_v7 }
  0x6a   : > { %548 = vst [vmem:[%s1362_s27 + $0x100] sm:$0xff] %v484_v0  ;;  %549 = vst [vmem:[%s1362_s27 + $0x108] sm:$0xff] %v485_v1  ;;  %v308_v36 = vld [vmem:[%s1301_s29 + $0x380] sm:$0xff]  ;;  %v309_v37 = vld [vmem:[%s1301_s29 + $0x388] sm:$0xff]  ;;  %v499_v40 = vmax.f32 %v307_v35, 0.0  ;;  %v914_v54 = vpop.eup %913  ;;  %933 = vtanh.f32 %v1485_v15 }
  0x6b   : > { %550 = vst [vmem:[%s1362_s27 + $0x110] sm:$0xff] %v486_v2  ;;  %412 = vst [vmem:[%s1324_s7 + $0xc0] sm:$0xff] %v904_v14  ;;  %v238_v39 = vld [vmem:[%s1301_s29 + $0x150] sm:$0xff]  ;;  %v500_v41 = vmax.f32 %v308_v36, 0.0  ;;  %v501_v42 = vmax.f32 %v309_v37, 0.0  ;;  %v311_v44 = vld [vmem:[%s1301_s29 + $0x398] sm:$0xff]  ;;  %v916_v61 = vpop.eup %915  ;;  %935 = vtanh.f32 %v236_v23 }
  0x6c   : > { %551 = vst [vmem:[%s1362_s27 + $0x118] sm:$0xff] %v487_v8  ;;  %552 = vst [vmem:[%s1362_s27 + $0x120] sm:$0xff] %v488_v9  ;;  %v310_v43 = vld [vmem:[%s1301_s29 + $0x390] sm:$0xff]  ;;  %v312_v45 = vld [vmem:[%s1301_s29 + $0x3a0] sm:$0xff]  ;;  %v503_v49 = vmax.f32 %v311_v44, 0.0  ;;  %v918_v4 = vpop.eup %917  ;;  %937 = vtanh.f32 %v237_v31 }
  0x6d   : > { %553 = vst [vmem:[%s1362_s27 + $0x128] sm:$0xff] %v489_v10  ;;  %413 = vst [vmem:[%s1324_s7 + $0xc8] sm:$0xff] %v906_v22  ;;  %v239_v47 = vld [vmem:[%s1301_s29 + $0x158] sm:$0xff]  ;;  %v502_v48 = vmax.f32 %v310_v43, 0.0  ;;  %v504_v50 = vmax.f32 %v312_v45, 0.0  ;;  %v313_v51 = vld [vmem:[%s1301_s29 + $0x3a8] sm:$0xff]  ;;  %v920_v11 = vpop.eup %919  ;;  %939 = vtanh.f32 %v238_v39 }
  0x6e   : > { %554 = vst [vmem:[%s1362_s27 + $0x130] sm:$0xff] %v490_v16  ;;  %555 = vst [vmem:[%s1362_s27 + $0x138] sm:$0xff] %v491_v17  ;;  %v314_v52 = vld [vmem:[%s1301_s29 + $0x3b0] sm:$0xff]  ;;  %v315_v53 = vld [vmem:[%s1301_s29 + $0x3b8] sm:$0xff]  ;;  %v505_v55 = vmax.f32 %v313_v51, 0.0  ;;  %v922_v15 = vpop.eup %921  ;;  %941 = vtanh.f32 %v239_v47 }
  0x6f   : > { %556 = vst [vmem:[%s1362_s27 + $0x140] sm:$0xff] %v492_v18  ;;  %414 = vst [vmem:[%s1324_s7 + $0xd0] sm:$0xff] %v908_v30  ;;  %v506_v56 = vmax.f32 %v314_v52, 0.0  ;;  %v507_v57 = vmax.f32 %v315_v53, 0.0  ;;  %v316_v58 = vld [vmem:[%s1301_s29 + $0x3c0] sm:$0xff]  ;;  %v317_v59 = vld [vmem:[%s1301_s29 + $0x3c8] sm:$0xff]  ;;  %v924_v17 = vpop.eup %923 }
  0x70   : > { %557 = vst [vmem:[%s1362_s27 + $0x148] sm:$0xff] %v493_v24  ;;  %558 = vst [vmem:[%s1362_s27 + $0x150] sm:$0xff] %v494_v25  ;;  %v318_v60 = vld [vmem:[%s1301_s29 + $0x3d0] sm:$0xff]  ;;  %v508_v62 = vmax.f32 %v316_v58, 0.0  ;;  %v509_v63 = vmax.f32 %v317_v59, 0.0  ;;  %v319_v1 = vld [vmem:[%s1301_s29 + $0x3d8] sm:$0xff]  ;;  %v926_v20 = vpop.eup %925 }
  0x71   : > { %559 = vst [vmem:[%s1362_s27 + $0x158] sm:$0xff] %v495_v26  ;;  %415 = vst [vmem:[%s1324_s7 + $0xd8] sm:$0xff] %v910_v38  ;;  %v510_v0 = vmax.f32 %v318_v60, 0.0  ;;  %v320_v2 = vld [vmem:[%s1301_s29 + $0x3e0] sm:$0xff]  ;;  %v321_v3 = vld [vmem:[%s1301_s29 + $0x3e8] sm:$0xff]  ;;  %v511_v6 = vmax.f32 %v319_v1, 0.0 }
  0x72   : > { %560 = vst [vmem:[%s1362_s27 + $0x160] sm:$0xff] %v496_v32  ;;  %561 = vst [vmem:[%s1362_s27 + $0x168] sm:$0xff] %v497_v33  ;;  %v240_v5 = vld [vmem:[%s1301_s29 + $0x160] sm:$0xff]  ;;  %v512_v7 = vmax.f32 %v320_v2, 0.0  ;;  %v513_v8 = vmax.f32 %v321_v3, 0.0  ;;  %v322_v9 = vld [vmem:[%s1301_s29 + $0x3f0] sm:$0xff] }
  0x73   : > { %562 = vst [vmem:[%s1362_s27 + $0x170] sm:$0xff] %v498_v34  ;;  %416 = vst [vmem:[%s1324_s7 + $0xe0] sm:$0xff] %v912_v46  ;;  %v323_v10 = vld [vmem:[%s1301_s29 + $0x3f8] sm:$0xff]  ;;  %v241_v12 = vld [vmem:[%s1301_s29 + $0x168] sm:$0xff]  ;;  %v514_v13 = vmax.f32 %v322_v9, 0.0  ;;  %943 = vtanh.f32 %v240_v5 }
  0x74   : > { %563 = vst [vmem:[%s1362_s27 + $0x178] sm:$0xff] %v499_v40  ;;  %564 = vst [vmem:[%s1362_s27 + $0x180] sm:$0xff] %v500_v41  ;;  %v515_v14 = vmax.f32 %v323_v10, 0.0  ;;  %v242_v16 = vld [vmem:[%s1301_s29 + $0x170] sm:$0xff]  ;;  %v243_v18 = vld [vmem:[%s1301_s29 + $0x178] sm:$0xff]  ;;  %945 = vtanh.f32 %v241_v12 }
  0x75   : > { %565 = vst [vmem:[%s1362_s27 + $0x188] sm:$0xff] %v501_v42  ;;  %417 = vst [vmem:[%s1324_s7 + $0xe8] sm:$0xff] %v914_v54  ;;  %v244_v19 = vld [vmem:[%s1301_s29 + $0x180] sm:$0xff] }
  0x76   : > { %566 = vst [vmem:[%s1362_s27 + $0x190] sm:$0xff] %v502_v48  ;;  %567 = vst [vmem:[%s1362_s27 + $0x198] sm:$0xff] %v503_v49 }
  0x77   : > { %568 = vst [vmem:[%s1362_s27 + $0x1a0] sm:$0xff] %v504_v50  ;;  %418 = vst [vmem:[%s1324_s7 + $0xf0] sm:$0xff] %v916_v61 }
  0x78   : > { %569 = vst [vmem:[%s1362_s27 + $0x1a8] sm:$0xff] %v505_v55  ;;  %570 = vst [vmem:[%s1362_s27 + $0x1b0] sm:$0xff] %v506_v56 }
  0x79   : > { %571 = vst [vmem:[%s1362_s27 + $0x1b8] sm:$0xff] %v507_v57  ;;  %419 = vst [vmem:[%s1324_s7 + $0xf8] sm:$0xff] %v918_v4 }
  0x7a   : > { %572 = vst [vmem:[%s1362_s27 + $0x1c0] sm:$0xff] %v508_v62  ;;  %573 = vst [vmem:[%s1362_s27 + $0x1c8] sm:$0xff] %v509_v63 }
  0x7b   : > { %574 = vst [vmem:[%s1362_s27 + $0x1d0] sm:$0xff] %v510_v0  ;;  %420 = vst [vmem:[%s1324_s7 + $0x100] sm:$0xff] %v920_v11 }
  0x7c   : > { %575 = vst [vmem:[%s1362_s27 + $0x1d8] sm:$0xff] %v511_v6  ;;  %576 = vst [vmem:[%s1362_s27 + $0x1e0] sm:$0xff] %v512_v7 }
  0x7d   : > { %577 = vst [vmem:[%s1362_s27 + $0x1e8] sm:$0xff] %v513_v8  ;;  %421 = vst [vmem:[%s1324_s7 + $0x108] sm:$0xff] %v922_v15 }
  0x7e   : > { %578 = vst [vmem:[%s1362_s27 + $0x1f0] sm:$0xff] %v514_v13  ;;  %579 = vst [vmem:[%s1362_s27 + $0x1f8] sm:$0xff] %v515_v14 }
  0x7f   : > { %422 = vst [vmem:[%s1324_s7 + $0x110] sm:$0xff] %v924_v17 }
  0x80   : > { %1026 = shalt.err (!%p1023_p4)
}
  0x81   : > { %s1027_s18 = scalar_lea.hbm %s1561_s3, 8192  ;;  %s1031_s22 = scalar_lea.hbm %s1716_s2, 32768 }
  0x82   : > { %p1028_p6 = scmp.ne.s32.totalorder %s1561_s3, %s1027_s18  ;;  %p1032_p1 = scmp.lt.u32.totalorder %s1561_s3, %s1716_s2 }
  0x83   : > { %p1033_p3 = scmp.lt.u32.totalorder %s1031_s22, %s1027_s18  ;;  %p1035_p8 = scmp.lt.u32.totalorder %s1027_s18, %s1561_s3 }
  0x84   : > { %p1029_p7 = pnand %p1028_p6, %p1724_p9 }
  0x85   : > { %p1034_p5 = por %p1033_p3, %p1032_p1 }
  0x86   : > { %p1030_p10 = pneg %p1029_p7 }
  0x87   : > { %p1036_p12 = por %p1035_p8, %p1034_p5 }
  0x89   : > { %p1037_p0 = pnand %p1036_p12, %p1030_p10 }
  0x8b   : > { %1040 = shalt.err (!%p1037_p0)
}
  0x8c   : > { %s1150_s4 = smov 512   ;;  %s1151_s8 = smov 1024   ;;  %v928_v21 = vpop.eup %927  ;;  %423 = vst [vmem:[%s1324_s7 + $0x118] sm:$0xff] %v926_v20  ;;  %947 = vtanh.f32 %v242_v16  ;;  %v245_v22 = vld [vmem:[%s1301_s29 + $0x188] sm:$0xff]  ;;  %v246_v24 = vld [vmem:[%s1301_s29 + $0x190] sm:$0xff]  ;;  %v247_v26 = vld [vmem:[%s1301_s29 + $0x198] sm:$0xff] }
  0x8d   : > { %s1152_s24 = smov 32   ;;  %v930_v23 = vpop.eup %929  ;;  %424 = vst [vmem:[%s1324_s7 + $0x120] sm:$0xff] %v928_v21  ;;  %949 = vtanh.f32 %v243_v18  ;;  %v248_v28 = vld [vmem:[%s1301_s29 + $0x1a0] sm:$0xff]  ;;  %v249_v30 = vld [vmem:[%s1301_s29 + $0x1a8] sm:$0xff]  ;;  %v250_v32 = vld [vmem:[%s1301_s29 + $0x1b0] sm:$0xff]  ;;  %s581_s18 = scalar_lea.sflag [#allocation4], %s1297_s5 }
  0x8e   : > { %769 = dma.vmem_to_hbm [thread:$0]  (%p1724_p9), %s1565_s17, 8192, %s1561_s3, %s586_s23, %s1150_s4, %s1151_s8, %s1152_s24   ;;  %v932_v25 = vpop.eup %931  ;;  %951 = vtanh.f32 %v244_v19 }
  0x8f   : > { %425 = vst [vmem:[%s1324_s7 + $0x128] sm:$0xff] %v930_v23  ;;  %v934_v27 = vpop.eup %933  ;;  %426 = vst [vmem:[%s1324_s7 + $0x130] sm:$0xff] %v932_v25  ;;  %953 = vtanh.f32 %v245_v22  ;;  %v251_v34 = vld [vmem:[%s1301_s29 + $0x1b8] sm:$0xff]  ;;  %v252_v36 = vld [vmem:[%s1301_s29 + $0x1c0] sm:$0xff]  ;;  %s1653_s23 = scalar_lea.hbm %s1715_s1, %s760_s13  ;;  %s1153_s12 = smov [#allocation5]  }
  0x90   : > { %v936_v29 = vpop.eup %935  ;;  %427 = vst [vmem:[%s1324_s7 + $0x138] sm:$0xff] %v934_v27  ;;  %955 = vtanh.f32 %v246_v24  ;;  %v253_v38 = vld [vmem:[%s1301_s29 + $0x1c8] sm:$0xff]  ;;  %v254_v40 = vld [vmem:[%s1301_s29 + $0x1d0] sm:$0xff]  ;;  %v255_v42 = vld [vmem:[%s1301_s29 + $0x1d8] sm:$0xff]  ;;  %s1045_s27 = sshll.u32 %s1153_s12, 4  ;;  %s1046_s27 = int_to_ptr.vmem [resolvable:$false] %s1045_s27 }
  0x91   : > { %v938_v31 = vpop.eup %937  ;;  %428 = vst [vmem:[%s1324_s7 + $0x140] sm:$0xff] %v936_v29  ;;  %957 = vtanh.f32 %v247_v26  ;;  %v256_v44 = vld [vmem:[%s1301_s29 + $0x1e0] sm:$0xff]  ;;  %v257_v46 = vld [vmem:[%s1301_s29 + $0x1e8] sm:$0xff]  ;;  %v258_v48 = vld [vmem:[%s1301_s29 + $0x1f0] sm:$0xff]  ;;  %s1047_s22 = scalar_lea.vmem %s1046_s27, 16384 }
  0x92   : > { %v940_v33 = vpop.eup %939  ;;  %429 = vst [vmem:[%s1324_s7 + $0x148] sm:$0xff] %v938_v31  ;;  %959 = vtanh.f32 %v248_v28  ;;  %v259_v50 = vld [vmem:[%s1301_s29 + $0x1f8] sm:$0xff]  ;;  %s601_s29 = sshll.u32 %s1324_s7, 4  ;;  %s1655_s29 = int_to_ptr.vmem [resolvable:$true] %s601_s29 }
  0x93   : > { %v942_v35 = vpop.eup %941  ;;  %430 = vst [vmem:[%s1324_s7 + $0x150] sm:$0xff] %v940_v33  ;;  %961 = vtanh.f32 %v249_v30  ;;  %s1041_s21 = scalar_lea.vmem %s1655_s29, 8192  ;;  %p1048_p4 = scmp.lt.s32.totalorder %s1655_s29, %s1046_s27 }
  0x94   : > { %v944_v37 = vpop.eup %943  ;;  %431 = vst [vmem:[%s1324_s7 + $0x158] sm:$0xff] %v942_v35  ;;  %963 = vtanh.f32 %v250_v32  ;;  %p1042_p11 = scmp.ne.s32.totalorder %s1655_s29, %s1041_s21  ;;  %p1049_p6 = scmp.lt.s32.totalorder %s1047_s22, %s1041_s21 }
  0x95   : > { %v946_v39 = vpop.eup %945  ;;  %432 = vst [vmem:[%s1324_s7 + $0x160] sm:$0xff] %v944_v37  ;;  %965 = vtanh.f32 %v251_v34 }
  0x96   : > { %v948_v41 = vpop.eup %947  ;;  %433 = vst [vmem:[%s1324_s7 + $0x168] sm:$0xff] %v946_v39  ;;  %967 = vtanh.f32 %v252_v36  ;;  %p1043_p13 = pnand %p1042_p11, %p1724_p9  ;;  %p1050_p7 = por %p1049_p6, %p1048_p4 }
  0x97   : > { %v950_v43 = vpop.eup %949  ;;  %434 = vst [vmem:[%s1324_s7 + $0x170] sm:$0xff] %v948_v41  ;;  %969 = vtanh.f32 %v253_v38 }
  0x98   : > { %v952_v45 = vpop.eup %951  ;;  %435 = vst [vmem:[%s1324_s7 + $0x178] sm:$0xff] %v950_v43  ;;  %971 = vtanh.f32 %v254_v40  ;;  %p1044_p2 = pneg %p1043_p13 }
  0x99   : > { %v954_v47 = vpop.eup %953  ;;  %436 = vst [vmem:[%s1324_s7 + $0x180] sm:$0xff] %v952_v45  ;;  %973 = vtanh.f32 %v255_v42 }
  0x9a   : > { %v956_v49 = vpop.eup %955  ;;  %437 = vst [vmem:[%s1324_s7 + $0x188] sm:$0xff] %v954_v47  ;;  %975 = vtanh.f32 %v256_v44  ;;  %p1051_p10 = pnand %p1050_p7, %p1044_p2 }
  0x9b   : > { %v958_v51 = vpop.eup %957  ;;  %438 = vst [vmem:[%s1324_s7 + $0x190] sm:$0xff] %v956_v49  ;;  %977 = vtanh.f32 %v257_v46 }
  0x9c   : > { %v960_v52 = vpop.eup %959  ;;  %439 = vst [vmem:[%s1324_s7 + $0x198] sm:$0xff] %v958_v51  ;;  %979 = vtanh.f32 %v258_v48 }
  0x9d   : > { %v962_v53 = vpop.eup %961  ;;  %440 = vst [vmem:[%s1324_s7 + $0x1a0] sm:$0xff] %v960_v52  ;;  %981 = vtanh.f32 %v259_v50 }
  0x9e   : > { %v964_v54 = vpop.eup %963  ;;  %441 = vst [vmem:[%s1324_s7 + $0x1a8] sm:$0xff] %v962_v53 }
  0x9f   : > { %v966_v55 = vpop.eup %965  ;;  %442 = vst [vmem:[%s1324_s7 + $0x1b0] sm:$0xff] %v964_v54 }
  0xa0   : > { %v968_v56 = vpop.eup %967  ;;  %443 = vst [vmem:[%s1324_s7 + $0x1b8] sm:$0xff] %v966_v55 }
  0xa1   : > { %v970_v57 = vpop.eup %969  ;;  %444 = vst [vmem:[%s1324_s7 + $0x1c0] sm:$0xff] %v968_v56 }
  0xa2   : > { %v972_v58 = vpop.eup %971  ;;  %445 = vst [vmem:[%s1324_s7 + $0x1c8] sm:$0xff] %v970_v57 }
  0xa3   : > { %v974_v59 = vpop.eup %973  ;;  %446 = vst [vmem:[%s1324_s7 + $0x1d0] sm:$0xff] %v972_v58 }
  0xa4   : > { %v976_v60 = vpop.eup %975  ;;  %447 = vst [vmem:[%s1324_s7 + $0x1d8] sm:$0xff] %v974_v59 }
  0xa5   : > { %v978_v61 = vpop.eup %977  ;;  %448 = vst [vmem:[%s1324_s7 + $0x1e0] sm:$0xff] %v976_v60 }
  0xa6   : > { %v980_v62 = vpop.eup %979  ;;  %449 = vst [vmem:[%s1324_s7 + $0x1e8] sm:$0xff] %v978_v61 }
  0xa7   : > { %v982_v63 = vpop.eup %981  ;;  %450 = vst [vmem:[%s1324_s7 + $0x1f0] sm:$0xff] %v980_v62 }
  0xa8   : > { %451 = vst [vmem:[%s1324_s7 + $0x1f8] sm:$0xff] %v982_v63 }
  0xa9   : > { %1054 = shalt.err (!%p1051_p10)
}
  0xaa   : > { %s1055_s7 = scalar_lea.hbm %s1653_s23, 8192  ;;  %s1059_s6 = scalar_lea.hbm %s1715_s1, 32768 }
  0xab   : > { %p1056_p1 = scmp.ne.s32.totalorder %s1653_s23, %s1055_s7  ;;  %p1060_p8 = scmp.lt.u32.totalorder %s1653_s23, %s1715_s1 }
  0xac   : > { %p1061_p12 = scmp.lt.u32.totalorder %s1059_s6, %s1055_s7  ;;  %p1063_p11 = scmp.lt.u32.totalorder %s1055_s7, %s1653_s23 }
  0xad   : > { %p1057_p3 = pnand %p1056_p1, %p1724_p9 }
  0xae   : > { %p1062_p0 = por %p1061_p12, %p1060_p8 }
  0xaf   : > { %p1058_p5 = pneg %p1057_p3 }
  0xb0   : > { %p1064_p13 = por %p1063_p11, %p1062_p0 }
  0xb2   : > { %p1065_p2 = pnand %p1064_p13, %p1058_p5 }
  0xb4   : > { %1068 = shalt.err (!%p1065_p2)
}
  0xb5   : > { %768 = dma.vmem_to_hbm [thread:$0]  (%p1724_p9), %s1655_s29, 8192, %s1653_s23, %s581_s18, %s1150_s4, %s1151_s8, %s1152_s24  }
  0xb6 PF: > { %p784_p4 = scmp.ge.s32.totalorder %s1143_s16, 2  ;;  %s634_s21 = sand.u32 1, %s1115_s9  }
  0xb7   : > { %p1725_p6 = scmp.ne.s32.totalorder %s1721_s28, 0  ;;  %s635_s12 = scalar_lea.sflag [#allocation4], %s634_s21 }
  0xb9   : > { %p777_p7 = pnand %p784_p4, %p1725_p6 }
  0xbb   : > { %1106 = dma.done.wait (!%p777_p7), %s635_s12, 8192  }
  0xbc   : > { %1108 = vsyncadd (!%p777_p7), %s635_s12, 4294959104  ;;  %s644_s25 = scalar_lea.sflag [#allocation7], %s634_s21 }
  0xbd   : > { %1110 = dma.done.wait (!%p777_p7), %s644_s25, 8192  }
  0xbe   : > { %1112 = vsyncadd (!%p777_p7), %s644_s25, 4294959104  ;;  %s22_s16 = sadd.s32 1, %s1143_s16   ;;  %s1726_s9 = smov %s1119_s10 }
  0xbf   : > { %p19_p10 = scmp.ge.s32.totalorder %s22_s16, 6   ;;  %s1727_s10 = smov %s1123_s11 }
  0xc0   : > { %s1728_s11 = smov %s1247_s30  ;;  %s1729_s12 = smov %s1135_s14 }
  0xc1   : > { %s1730_s13 = smov %s1139_s15  ;;  %s1731_s14 = smov %s1734_s19 }
  0xc2   : > { %s1732_s15 = smov %s1738_s20  ;;  %21 = sbr.rel (!%p19_p10) target bundleno = 9 (0x9), region = 86 }
  0xc9   :  { %649 = vsyncpa [#allocation3], 1 }
  0xca   :  { %651 = vsyncpa [#allocation3 + $0x1], 1 }
  0xcb   :  { %652 = vsyncpa [#allocation4], 1 }
  0xcc   :  { %654 = vsyncpa [#allocation4 + $0x1], 1 }
  0xcd   :  { %655 = vsyncpa [#allocation7], 1 }
  0xce   :  { %657 = vsyncpa [#allocation7 + $0x1], 1 }

</bundles_post_ra>
